<compile_context>
chip_gen: v6e
topology: v6e:2x2x1
jax: 0.10.0
libtpu: 0.0.40
codegen_flags: <defaults>
</compile_context>

<pallas_src>
import jax
import jax.numpy as jnp
from jax.experimental import pallas as pl
from jax.experimental.pallas import tpu as pltpu


# Upper bound on the batch tile. 256 matches the 256-wide MXU on v6e/v7x and
# is legal (and fine) on v5e as well.
_MAX_BATCH_TILE = 256

# Conservative VMEM budget for tile sizing (safe under the default scoped
# limit on v5e/v6e/v7x without touching vmem_limit_bytes).
_VMEM_BUDGET_BYTES = 12 * 1024 * 1024


def _softplus(x):
    # Matches torch.nn.Softplus(beta=1, threshold=20):
    #   softplus(x) = log(1 + exp(x)); returns x directly when x > 20.
    safe = jnp.minimum(x, 20.0)
    return jnp.where(x > 20.0, x, jnp.log1p(jnp.exp(safe)))


def fcnn_alpha_kernel(x_ref, w1_ref, aux_ref, o_ref):
    # x_ref   : [TB, D]    one batch tile of flattened inputs (batch in sublanes)
    # w1_ref  : [H, D]     fc1 weight, untransposed (PyTorch layout)
    # aux_ref : [H+1, 2]   column 0 = [b1; 0], column 1 = [w2; b2]
    # o_ref   : [1, TB]    lane-dense output tile (batch in lanes)
    h_dim = w1_ref.shape[0]
    b1_col = aux_ref[0:h_dim, 0:1]              # [H, 1]
    w2_col = aux_ref[0:h_dim, 1:2]              # [H, 1]
    b2 = aux_ref[h_dim:h_dim + 1, 1:2]          # [1, 1]

    # Layer 1 on the MXU: contract the feature axis of both operands directly,
    # so neither x nor w1 needs a transpose; result keeps batch in the lanes.
    h = jax.lax.dot_general(
        w1_ref[...], x_ref[...],
        dimension_numbers=(((1,), (1,)), ((), ())),
        preferred_element_type=jnp.float32)      # [H, TB]
    h = _softplus(h + b1_col)

    # Layer 2 (output_size == 1) on VPU + XLU: scale by w2, sublane-reduce.
    y = jnp.sum(h * w2_col, axis=0, keepdims=True) + b2   # [1, TB]
    o_ref[...] = _softplus(y)


def _choose_batch_tile(b, d, h):
    """Largest batch tile (multiple of 8, <= _MAX_BATCH_TILE) fitting VMEM."""
    if b <= _MAX_BATCH_TILE:
        cap = max(8, -(-b // 8) * 8)             # single tile, sublane-padded
    else:
        cap = _MAX_BATCH_TILE
    tb = cap
    while tb > 8:
        # x tile double-buffered + resident w1 + aux + output tile (f32).
        vmem = 4 * (2 * tb * d + 2 * h * d + 2 * (h + 1) * 2 + 2 * tb)
        if vmem <= _VMEM_BUDGET_BYTES:
            break
        tb -= 8
    return tb


@jax.jit
def fcnn_alpha_batched(x, prepared):
    """Run the 2-layer MLP on a stack of flattened inputs.

    x: [B, D] f32 — each row is concat(W.reshape(-1), C.reshape(-1)) of one
    independent module call. Returns [B] f32 (alpha per sample).
    """
    w1, aux = prepared["w1"], prepared["aux"]
    b, d = x.shape
    h = w1.shape[0]
    assert w1.shape == (h, d), "fc1 weight / input size mismatch"

    tb = _choose_batch_tile(b, d, h)
    b_pad = -(-b // tb) * tb
    if b_pad != b:
        x = jnp.pad(x, ((0, b_pad - b), (0, 0)))

    out = pl.pallas_call(
        fcnn_alpha_kernel,
        out_shape=jax.ShapeDtypeStruct((1, b_pad), jnp.float32),
        grid_spec=pltpu.PrefetchScalarGridSpec(
            num_scalar_prefetch=0,
            grid=(b_pad // tb,),
            in_specs=[
                pl.BlockSpec((tb, d), lambda i: (i, 0)),        # batch tile
                pl.BlockSpec((h, d), lambda i: (0, 0)),         # weights resident
                pl.BlockSpec((h + 1, 2), lambda i: (0, 0)),     # packed b1/w2/b2
            ],
            out_specs=pl.BlockSpec((1, tb), lambda i: (0, i)),  # lane-dense out
        ),
        compiler_params=pltpu.CompilerParams(
            dimension_semantics=("parallel",)),   # shards batch over v7x's 2 TCs
    )(x, w1, aux)

    return out[0, :b]


@jax.jit
def fcnn_alpha_forward(W, C, prepared):
    """Pallas implementation of FCNN_alpha.forward (single module call).

    W: [batch, W_size], C: [batch, C_size] — flattened and concatenated into
    one feature vector, exactly like the PyTorch module. Returns shape [1].
    """
    x = jnp.concatenate(
        [W.reshape(-1), C.reshape(-1)]).astype(jnp.float32)[None, :]
    return fcnn_alpha_batched(x, prepared)        # shape [1] == [output_size]


def prepare_params(params):
    """One-time repack of PyTorch-layout params for the kernel.

    Returns {"w1": [H, D], "aux": [H+1, 2]} where aux packs b1, w2, b2 so the
    kernel needs only three input DMAs per call.
    """
    w1 = jnp.asarray(params["w1"], jnp.float32)                 # [H, D]
    b1 = jnp.asarray(params["b1"], jnp.float32).reshape(-1)     # [H]
    w2 = jnp.asarray(params["w2"], jnp.float32)                 # [O, H]
    b2 = jnp.asarray(params["b2"], jnp.float32).reshape(-1)     # [O]
    h = w1.shape[0]
    # Kernel implements the module default output_size=1 (alpha is a scalar).
    assert w2.shape == (1, h) and b2.shape == (1,), "output_size must be 1"
    aux = jnp.zeros((h + 1, 2), jnp.float32)
    aux = aux.at[:h, 0].set(b1)
    aux = aux.at[:h, 1].set(w2[0])
    aux = aux.at[h, 1].set(b2[0])
    return {"w1": w1, "aux": aux}


def init_params(key, input_size, hidden_size, output_size=1):
    """Deterministic synthetic init (PyTorch-Linear-style uniform bounds)."""
    k1, k2, k3, k4 = jax.random.split(key, 4)
    bound1 = 1.0 / jnp.sqrt(input_size)
    bound2 = 1.0 / jnp.sqrt(hidden_size)
    return {
        "w1": jax.random.uniform(k1, (hidden_size, input_size), jnp.float32,
                                 -bound1, bound1),
        "b1": jax.random.uniform(k2, (hidden_size,), jnp.float32,
                                 -bound1, bound1),
        "w2": jax.random.uniform(k3, (output_size, hidden_size), jnp.float32,
                                 -bound2, bound2),
        "b2": jax.random.uniform(k4, (output_size,), jnp.float32,
                                 -bound2, bound2),
    }


if __name__ == "__main__":
    key = jax.random.PRNGKey(0)
    kW, kC, kP, kB = jax.random.split(key, 4)

    batch, w_size, c_size = 2, 8, 8
    input_size = batch * w_size + batch * c_size   # forward flattens W and C
    hidden_size = 32
    output_size = 1

    W = jax.random.normal(kW, (batch, w_size), jnp.float32)
    C = jax.random.normal(kC, (batch, c_size), jnp.float32)
    params = init_params(kP, input_size, hidden_size, output_size)
    prepared = prepare_params(params)

    # Pure-JAX reference of the same math (single flattened sample -> [1]).
    def ref_forward(x_vec):
        hh = jax.nn.softplus(x_vec @ params["w1"].T + params["b1"])
        return jax.nn.softplus(hh @ params["w2"].T + params["b2"])

    # --- single module call (exact FCNN_alpha.forward semantics) -----------
    alpha = fcnn_alpha_forward(W, C, prepared)
    jax.block_until_ready(alpha)
    x_vec = jnp.concatenate([W.reshape(-1), C.reshape(-1)])
    ref = ref_forward(x_vec)
    assert alpha.shape == (output_size,)
    assert jnp.allclose(alpha, ref, atol=1e-5, rtol=1e-5), (alpha, ref)

    # --- batched path: many independent (W, C) pairs in one kernel call ----
    n_samples = 16
    X = jax.random.normal(kB, (n_samples, input_size), jnp.float32)
    alphas = fcnn_alpha_batched(X, prepared)
    jax.block_until_ready(alphas)
    ref_b = jax.vmap(ref_forward)(X).reshape(-1)
    assert alphas.shape == (n_samples,)
    assert jnp.allclose(alphas, ref_b, atol=1e-5, rtol=1e-5), (alphas, ref_b)

    print("KERNEL_OK")
</pallas_src>

<mosaic_0001>
module attributes {stable_mosaic.version = 11 : i64} {
  func.func @fcnn_alpha_kernel(%arg0: i32, %arg1: memref<8x32xf32, #tpu.memory_space<vmem>>, %arg2: memref<32x32xf32, #tpu.memory_space<vmem>>, %arg3: memref<33x2xf32, #tpu.memory_space<vmem>>, %arg4: memref<1x8xf32, #tpu.memory_space<vmem>>) attributes {dimension_semantics = [#tpu.dimension_semantics<parallel>], iteration_bounds = array<i64: 1>, scalar_prefetch = 0 : i64, scratch_operands = 0 : i64, tpu.core_type = #tpu.core_type<tc>, window_params = [{transform_indices = @transform_0, window_bounds = array<i64: 8, 32>}, {pipeline_mode = #tpu.pipeline_mode<synchronous>, transform_indices = @transform_1, window_bounds = array<i64: 32, 32>}, {pipeline_mode = #tpu.pipeline_mode<synchronous>, transform_indices = @transform_2, window_bounds = array<i64: 33, 2>}, {transform_indices = @transform_3, window_bounds = array<i64: 1, 8>}]} {
    %c0 = arith.constant 0 : index
    %c0_0 = arith.constant 0 : index
    %0 = vector.load %arg3[%c0, %c0_0] : memref<33x2xf32, #tpu.memory_space<vmem>>, vector<32x1xf32>
    %c0_1 = arith.constant 0 : index
    %c1 = arith.constant 1 : index
    %1 = vector.load %arg3[%c0_1, %c1] : memref<33x2xf32, #tpu.memory_space<vmem>>, vector<32x1xf32>
    %c32 = arith.constant 32 : index
    %c1_2 = arith.constant 1 : index
    %2 = vector.load %arg3[%c32, %c1_2] : memref<33x2xf32, #tpu.memory_space<vmem>>, vector<1x1xf32>
    %c0_3 = arith.constant 0 : index
    %c0_4 = arith.constant 0 : index
    %3 = vector.load %arg2[%c0_3, %c0_4] : memref<32x32xf32, #tpu.memory_space<vmem>>, vector<32x32xf32>
    %c0_5 = arith.constant 0 : index
    %c0_6 = arith.constant 0 : index
    %4 = vector.load %arg1[%c0_5, %c0_6] : memref<8x32xf32, #tpu.memory_space<vmem>>, vector<8x32xf32>
    %cst = arith.constant dense<0.000000e+00> : vector<32x8xf32>
    %5 = tpu.matmul %3, %4, %cst {dimension_numbers = #tpu.dot_dimension_numbers<[1], [1], [0], [0], [0, 0, 1, 0], [], []>} : vector<32x32xf32>, vector<8x32xf32>, vector<32x8xf32> -> vector<32x8xf32>
    %6 = vector.broadcast %0 : vector<32x1xf32> to vector<32x8xf32>
    %7 = arith.addf %5, %6 : vector<32x8xf32>
    %cst_7 = arith.constant 2.000000e+01 : f32
    %8 = vector.broadcast %cst_7 : f32 to vector<32x8xf32>
    %9 = arith.minimumf %7, %8 : vector<32x8xf32>
    %cst_8 = arith.constant 2.000000e+01 : f32
    %10 = vector.broadcast %cst_8 : f32 to vector<32x8xf32>
    %11 = arith.cmpf ogt, %7, %10 : vector<32x8xf32>
    %12 = math.exp %9 : vector<32x8xf32>
    %13 = math.log1p %12 : vector<32x8xf32>
    %14 = arith.select %11, %7, %13 : vector<32x8xi1>, vector<32x8xf32>
    %15 = vector.broadcast %1 : vector<32x1xf32> to vector<32x8xf32>
    %16 = arith.mulf %14, %15 : vector<32x8xf32>
    %cst_9 = arith.constant dense<0.000000e+00> : vector<8xf32>
    %17 = vector.multi_reduction <add>, %16, %cst_9 [0] : vector<32x8xf32> to vector<8xf32>
    %18 = vector.shape_cast %17 : vector<8xf32> to vector<1x8xf32>
    %19 = vector.broadcast %2 : vector<1x1xf32> to vector<1x8xf32>
    %20 = arith.addf %18, %19 : vector<1x8xf32>
    %cst_10 = arith.constant 2.000000e+01 : f32
    %21 = vector.broadcast %cst_10 : f32 to vector<1x8xf32>
    %22 = arith.minimumf %20, %21 : vector<1x8xf32>
    %cst_11 = arith.constant 2.000000e+01 : f32
    %23 = vector.broadcast %cst_11 : f32 to vector<1x8xf32>
    %24 = arith.cmpf ogt, %20, %23 : vector<1x8xf32>
    %25 = math.exp %22 : vector<1x8xf32>
    %26 = math.log1p %25 : vector<1x8xf32>
    %27 = arith.select %24, %20, %26 : vector<1x8xi1>, vector<1x8xf32>
    %c0_12 = arith.constant 0 : index
    %c0_13 = arith.constant 0 : index
    %28 = vector.load %arg4[%c0_12, %c0_13] : memref<1x8xf32, #tpu.memory_space<vmem>>, vector<1x8xf32>
    tpu.vector_store %arg4[%c0_12, %c0_13], %27 {strides = array<i32>} : memref<1x8xf32, #tpu.memory_space<vmem>>, vector<1x8xf32>,
    return
  }
  func.func @transform_0(%arg0: i32) -> (i32, i32) {
    %c0_i32 = arith.constant 0 : i32
    %c0_i32_0 = arith.constant 0 : i32
    return %arg0, %c0_i32 : i32, i32
  }
  func.func @transform_1(%arg0: i32) -> (i32, i32) {
    %c0_i32 = arith.constant 0 : i32
    %c0_i32_0 = arith.constant 0 : i32
    %c0_i32_1 = arith.constant 0 : i32
    return %c0_i32, %c0_i32_0 : i32, i32
  }
  func.func @transform_2(%arg0: i32) -> (i32, i32) {
    %c0_i32 = arith.constant 0 : i32
    %c0_i32_0 = arith.constant 0 : i32
    %c0_i32_1 = arith.constant 0 : i32
    return %c0_i32, %c0_i32_0 : i32, i32
  }
  func.func @transform_3(%arg0: i32) -> (i32, i32) {
    %c0_i32 = arith.constant 0 : i32
    %c0_i32_0 = arith.constant 0 : i32
    return %c0_i32, %arg0 : i32, i32
  }
}

</mosaic_0001>

<bundles_post_ra>
// kernel: fcnn_alpha_batched.1
= control target key start
LH: loop header
LB: loop body
LE: loop exit
PB: predicated region body
PF: predicated region fallthrough
CT: control target
= control target key end

     0   :  { %vm45_vm0 = vcmask 261120   ;;  %s432_s0 = inlined_call_operand.vmem [shape: f32[8,32], index: 0, kind: input, shape index: {}]   ;;  %s433_s1 = inlined_call_operand.vmem [shape: f32[32,32], index: 1, kind: input, shape index: {}]   ;;  %s434_s2 = inlined_call_operand.vmem [shape: f32[33,2], index: 2, kind: input, shape index: {}]   ;;  %s435_s3 = inlined_call_operand.hbm [shape: f32[1,8], index: 3, kind: output, shape index: {}]  }
   0x1   :  { %v24_v0 = vld [vmem:[%s432_s0] sm:$0xff]  ;;  %v22_v2 = vld [vmem:[%s433_s1 + $0x10] sm:$0xff]  ;;  %v21_v3 = vld [vmem:[%s433_s1 + $0x8] sm:$0xff] }
   0x2   :  { %v20_v1 = vld [vmem:[%s433_s1] sm:$0xff]  ;;  %282 = vmatprep.subr.msk.mxu0 %vm45_vm0, %v24_v0  ;;  %290 = vmatprep.subr.msk.mxu1 %vm45_vm0, %v24_v0  ;;  %v23_v4 = vld [vmem:[%s433_s1 + $0x18] sm:$0xff]  ;;  %v17_v6 = vld [vmem:[%s434_s2 + $0x10] sm:$0xff] }
   0x3   :  { %283 = vmatpush3.xpose.msk.msra.mxu0 %vm45_vm0, %v24_v0  ;;  %291 = vmatpush3.xpose.msk.msra.mxu1 %vm45_vm0, %v24_v0  ;;  %v15_v5 = vld [vmem:[%s434_s2] sm:$0xff] }
   0x4   :  { %284 = vmatprep.mubr.msk.f32.mxu0 %vm45_vm0, %v20_v1  ;;  %287 = vmatprep.mubr.msk.f32.mxu1 %vm45_vm0, %v22_v2 }
   0x5   :  { %8 = vsyncpa [#allocation3], 0  ;;  %v341_v7 = vmov 0   ;;  %v16_v8 = vld [vmem:[%s434_s2 + $0x8] sm:$0xff]  ;;  %v18_v9 = vld [vmem:[%s434_s2 + $0x18] sm:$0xff]  ;;  %v342_v10 = vmov 1  }
   0x6   :  { %295 = vset.pattern.permute.xlu0 %v341_v7  ;;  %296 = vset.pattern.permute.xlu1 %v341_v7  ;;  %v19_v11 = vld [vmem:[%s434_s2 + $0x20] sm:$0x1]  ;;  %vm222_vm1 = vcmask 64512   ;;  %s343_s2 = smov [#allocation2]   ;;  %vm256_vm11 = vcmask 57344  }
   0x7   :  { %285 = vmatmul.mubr.msk.f32.vlgmr.msra.gmra.mxu0 %vm45_vm0, %v21_v3  ;;  %288 = vmatmul.mubr.msk.f32.vlgmr.msra.gmra.mxu1 %vm45_vm0, %v23_v4  ;;  %s264_s30 = sshll.u32 %s343_s2, 4  ;;  %s265_s30 = int_to_ptr.vmem [resolvable:$true] %s264_s30 }
   0x8   :  { %27 = vperm.xlu0 %295, %v15_v5   ;;  %37 = vperm.xlu1 %296, %v17_v6   ;;  %s319_s4 = scalar_lea.vmem %s265_s30, 16  ;;  %s323_s5 = scalar_lea.vmem %s265_s30, 32 }
   0x9   :  { %p320_p0 = scmp.ne.s32.totalorder %s265_s30, %s319_s4  ;;  %p324_p1 = scmp.lt.s32.totalorder %s265_s30, %s265_s30 }
   0xa   :  { %p325_p2 = scmp.lt.s32.totalorder %s323_s5, %s319_s4 }
   0xc   :  { %32 = vperm.xlu0 %295, %v16_v8   ;;  %42 = vperm.xlu1 %296, %v18_v9   ;;  %p326_p3 = por %p325_p2, %p324_p1 }
   0xe   :  { %p327_p4 = pnand %p326_p3, %p320_p0 }
  0x10   :  { %298 = vset.pattern.permute.xlu1 %v342_v10  ;;  %297 = vset.pattern.permute.xlu0 %v342_v10 }
  0x11   :  { %207 = vperm.xlu1 %298, %v16_v8   ;;  %203 = vperm.xlu0 %297, %v15_v5  }
  0x15   :  { %211 = vperm.xlu1 %298, %v17_v6   ;;  %215 = vperm.xlu0 %297, %v18_v9  }
  0x19   :  { %238 = vperm.xlu1 %298, %v19_v11  }
  0x83   :  { %v38_v12 = vpop.permute.xlu1 %37  ;;  %v28_v13 = vpop.permute.xlu0 %27 }
  0x87   :  { %v43_v14 = vpop.permute.xlu1 %42  ;;  %v33_v15 = vpop.permute.xlu0 %32 }
  0x8c   :  { %v204_v51 = vpop.permute.xlu0 %203  ;;  %v208_v52 = vpop.permute.xlu1 %207 }
  0x90   :  { %v216_v9 = vpop.permute.xlu0 %215  ;;  %v212_v11 = vpop.permute.xlu1 %211 }
  0xc7   :  { %v286_v16 = vpop.f32.mrf.mxu0  ;;  %v289_v17 = vpop.f32.mrf.mxu1 }
  0xc8   :  { %v133_v18 = vadd.f32 %v286_v16, %v33_v15  ;;  %v402_v19 = vadd.f32 %v289_v17, %v43_v14 }
  0xc9   :  { %v127_v20 = vpop.f32.mrf.mxu0  ;;  %v137_v21 = vpop.f32.mrf.mxu1 }
  0xca   :  { %v147_v22 = vmin.f32 %v133_v18, 20.0  ;;  %v149_v23 = vmin.f32 %v402_v19, 20.0  ;;  %v405_v24 = vadd.f32 %v127_v20, %v28_v13  ;;  %v407_v25 = vadd.f32 %v137_v21, %v38_v12 }
  0xcb   :  { %vm151_vm2 = vcmp.gt.f32.partialorder %v133_v18, 20.0  ;;  %vm153_vm9 = vcmp.gt.f32.partialorder %v402_v19, 20.0 }
  0xcc   :  { %v156_v26 = vmul.f32 1.442695, %v147_v22  ;;  %v160_v27 = vmul.f32 1.442695, %v149_v23  ;;  %v146_v28 = vmin.f32 %v405_v24, 20.0  ;;  %v148_v29 = vmin.f32 %v407_v25, 20.0 }
  0xcd   :  { %vm150_vm4 = vcmp.gt.f32.partialorder %v405_v24, 20.0  ;;  %vm152_vm7 = vcmp.gt.f32.partialorder %v407_v25, 20.0 }
  0xce   :  { %299 = vpow2.f32 %v156_v26  ;;  %v154_v30 = vmul.f32 1.442695, %v146_v28  ;;  %v158_v31 = vmul.f32 1.442695, %v148_v29 }
  0xcf   :  { %301 = vpow2.f32 %v160_v27 }
  0xd0   :  { %303 = vpow2.f32 %v154_v30 }
  0xd1   :  { %305 = vpow2.f32 %v158_v31  ;;  %v239_v31 = vpop.permute.xlu1 %238 }
  0xdb   :  { %v300_v32 = vpop.eup %299 }
  0xdc   :  { %v302_v33 = vpop.eup %301  ;;  %v171_v34 = vadd.f32 1.0, %v300_v32  ;;  %v174_v40 = vmul.f32 -0.5, %v300_v32  ;;  %v177_v45 = vand.u32 2147483647, %v300_v32 }
  0xdd   :  { %v304_v35 = vpop.eup %303  ;;  %v189_v38 = vadd.f32 1.0, %v302_v33  ;;  %v192_v44 = vmul.f32 -0.5, %v302_v33  ;;  %v195_v57 = vand.u32 2147483647, %v302_v33 }
  0xde   :  { %v306_v36 = vpop.eup %305  ;;  %307 = vlog2.f32 %v171_v34  ;;  %v162_v37 = vadd.f32 1.0, %v304_v35  ;;  %v165_v41 = vmul.f32 -0.5, %v304_v35  ;;  %v175_v43 = vadd.f32 1.0, %v174_v40 }
  0xdf   :  { %v180_v39 = vadd.f32 1.0, %v306_v36  ;;  %v183_v42 = vmul.f32 -0.5, %v306_v36  ;;  %v186_v46 = vand.u32 2147483647, %v306_v36  ;;  %v168_v50 = vand.u32 2147483647, %v304_v35 }
  0xe0   :  { %309 = vlog2.f32 %v162_v37  ;;  %v166_v47 = vadd.f32 1.0, %v165_v41  ;;  %v176_v54 = vmul.f32 %v300_v32, %v175_v43  ;;  %v193_v55 = vadd.f32 1.0, %v192_v44 }
  0xe1   :  { %311 = vlog2.f32 %v180_v39  ;;  %v184_v49 = vadd.f32 1.0, %v183_v42  ;;  %vm178_vm3 = vcmp.lt.f32.partialorder %v177_v45, 0.0004427343  ;;  %vm412_vm5 = vcmp.lt.f32.partialorder %v186_v46, 0.0004427343 }
  0xe2   :  { %313 = vlog2.f32 %v189_v38  ;;  %v167_v62 = vmul.f32 %v304_v35, %v166_v47  ;;  %vm169_vm6 = vcmp.lt.f32.partialorder %v168_v50, 0.0004427343  ;;  %v194_v6 = vmul.f32 %v302_v33, %v193_v55 }
  0xe3   :  { %v185_v2 = vmul.f32 %v306_v36, %v184_v49  ;;  %vm196_vm8 = vcmp.lt.f32.partialorder %v195_v57, 0.0004427343 }
  0xeb   :  { %v308_v48 = vpop.eup %307 }
  0xec   :  { %v173_v53 = vmul.f32 0.6931472, %v308_v48 }
  0xed   :  { %v310_v56 = vpop.eup %309 }
  0xee   :  { %v312_v58 = vpop.eup %311  ;;  %v179_v59 = vsel %vm178_vm3, %v176_v54, %v173_v53  ;;  %v164_v61 = vmul.f32 0.6931472, %v310_v56 }
  0xef   :  { %v314_v63 = vpop.eup %313  ;;  %v199_v0 = vsel %vm151_vm2, %v133_v18, %v179_v59  ;;  %v182_v1 = vmul.f32 0.6931472, %v312_v58 }
  0xf0   :  { %v219_v3 = vmul.f32 %v208_v52, %v199_v0  ;;  %v170_v4 = vsel %vm169_vm6, %v167_v62, %v164_v61  ;;  %v191_v5 = vmul.f32 0.6931472, %v314_v63 }
  0xf1   :  { %v188_v7 = vsel %vm412_vm5, %v185_v2, %v182_v1  ;;  %v198_v8 = vsel %vm150_vm4, %v405_v24, %v170_v4 }
  0xf2   :  { %v200_v10 = vsel %vm152_vm7, %v407_v25, %v188_v7  ;;  %v218_v12 = vmul.f32 %v204_v51, %v198_v8  ;;  %v197_v13 = vsel %vm196_vm8, %v194_v6, %v191_v5  ;;  %v224_v16 = vsel %vm222_vm1, %v219_v3, 0.0 }
  0xf3   :  { %v220_v14 = vmul.f32 %v212_v11, %v200_v10  ;;  %v201_v15 = vsel %vm153_vm9, %v402_v19, %v197_v13 }
  0xf4   :  { %v223_v17 = vsel %vm222_vm1, %v218_v12, 0.0  ;;  %v221_v18 = vmul.f32 %v216_v9, %v201_v15 }
  0xf5   :  { %v225_v20 = vadd.f32 %v224_v16, %v223_v17  ;;  %v226_v21 = vsel %vm222_vm1, %v220_v14, 0.0 }
  0xf6   :  { %v228_v23 = vsel %vm222_vm1, %v221_v18, 0.0 }
  0xf7   :  { %v227_v22 = vadd.f32 %v226_v21, %v225_v20 }
  0xf9   :  { %v229_v24 = vadd.f32 %v228_v23, %v227_v22 }
  0xfb   :  { %v230_v25 = vrot.slane %v229_v24, 4 }
  0xfd   :  { %v231_v26 = vadd.f32 %v230_v25, %v229_v24 }
  0xff   :  { %v232_v27 = vrot.slane %v231_v26, 2 }
 0x101   :  { %v233_v28 = vadd.f32 %v232_v27, %v231_v26 }
 0x103   :  { %v234_v29 = vrot.slane %v233_v28, 1 }
 0x105   :  { %v235_v30 = vadd.f32 %v234_v29, %v233_v28 }
 0x107   :  { %v241_v19 = vadd.f32 %v239_v31, %v235_v30 }
 0x109   :  { %v242_v32 = vmin.f32 %v241_v19, 20.0  ;;  %vm243_vm12 = vcmp.gt.f32.partialorder %v241_v19, 20.0 }
 0x10b   :  { %v244_v33 = vmul.f32 1.442695, %v242_v32 }
 0x10d   :  { %315 = vpow2.f32 %v244_v33 }
 0x11a   :  { %v316_v34 = vpop.eup %315 }
 0x11b   :  { %v246_v35 = vadd.f32 1.0, %v316_v34  ;;  %v249_v36 = vmul.f32 -0.5, %v316_v34  ;;  %v252_v38 = vand.u32 2147483647, %v316_v34 }
 0x11d   :  { %317 = vlog2.f32 %v246_v35  ;;  %v250_v37 = vadd.f32 1.0, %v249_v36  ;;  %vm253_vm10 = vcmp.lt.f32.partialorder %v252_v38, 0.0004427343 }
 0x11f   :  { %v251_v41 = vmul.f32 %v316_v34, %v250_v37 }
 0x12a   :  { %v318_v39 = vpop.eup %317 }
 0x12b   :  { %v248_v40 = vmul.f32 0.6931472, %v318_v39 }
 0x12d   :  { %v254_v42 = vsel %vm253_vm10, %v251_v41, %v248_v40 }
 0x12e   :  { %v255_v43 = vsel %vm243_vm12, %v241_v19, %v254_v42 }
 0x12f   :  { %257 = vst.msk [vmem:[#allocation2] sm:$0x1] %vm256_vm11, %v255_v43 }
 0x130   :  { %330 = shalt.err (!%p327_p4)
}
 0x131   :  { %267 = dma.vmem_to_hbm [thread:$0]  %s265_s30, 16, %s435_s3, [#allocation3]  }
 0x132   :  { %339 = dma.done.wait [#allocation3], 16  }
 0x133   :  { %340 = vsyncadd [#allocation3], 4294967280 }
 0x134   :  { %271 = vsyncpa [#allocation3], 1 }

</bundles_post_ra>
